<compile_context>
chip_gen: v7x
topology: tpu7x:2x2x1
jax: 0.10.0
libtpu: 0.0.40
codegen_flags: <defaults>
</compile_context>

<pallas_src>
import jax
import jax.numpy as jnp
from jax import lax
from jax.experimental import pallas as pl
from jax.experimental.pallas import tpu as pltpu

EPS = 1e-5


def _bn_relu(h, gamma, beta):
    """Training-mode BatchNorm (affine) + ReLU with one-pass statistics."""
    inv_n = 1.0 / h.shape[0]
    mean = jnp.sum(h, axis=0, keepdims=True) * inv_n
    var = jnp.sum(h * h, axis=0, keepdims=True) * inv_n - mean * mean
    hn = (h - mean) * lax.rsqrt(var + EPS) * gamma + beta
    return jnp.maximum(hn, 0.0)


def mobilenet1d_kernel(xcol_ref, w1_ref, wpw1_ref, wpw2_ref, wfc_ref,
                       pvec_ref, out_ref):
    B = out_ref.shape[0]
    M1 = xcol_ref.shape[0]            # B * L1
    L1 = M1 // B                      # conv1 output length (even; see wrapper)
    M2 = M1 // 2                      # B * L2
    L2 = L1 // 2                      # dw_conv2 output length

    def prow(r, c):                   # (1, c) row slice of the packed params
        return pvec_ref[r:r + 1, 0:c]

    b1, g1, be1 = prow(0, 32), prow(1, 32), prow(2, 32)
    bdw1, bpw1 = prow(3, 32), prow(4, 64)
    g2, be2 = prow(5, 64), prow(6, 64)
    bdw2, bpw2 = prow(7, 64), prow(8, 128)
    g3, be3 = prow(9, 128), prow(10, 128)
    bfc = prow(11, 2)
    wdw1 = [prow(12 + k, 32) for k in range(3)]
    wdw2 = [prow(15 + k, 64) for k in range(3)]

    # ---- conv1 (k=3, s=2, p=1) + bn1 + relu: one K=9 matmul ---------------
    h1 = jnp.dot(xcol_ref[...], w1_ref[...],
                 preferred_element_type=jnp.float32) + b1
    h1 = _bn_relu(h1, g1, be1)                                   # (M1, 32)

    # ---- dw_conv1 (k=3, s=1, p=1): halo taps via XLU roll + masks ---------
    i1 = lax.broadcasted_iota(jnp.int32, (M1, 1), 0) % L1
    h1_m1 = jnp.where(i1 == 0, 0.0,
                      pltpu.roll(h1, shift=1, axis=0))           # h1[i-1]
    h1_p1 = jnp.where(i1 == L1 - 1, 0.0,
                      pltpu.roll(h1, shift=M1 - 1, axis=0))      # h1[i+1]
    dw1 = h1_m1 * wdw1[0] + h1 * wdw1[1] + h1_p1 * wdw1[2] + bdw1

    # ---- pw_conv1 + bn2 + relu --------------------------------------------
    h2 = jnp.dot(dw1, wpw1_ref[...],
                 preferred_element_type=jnp.float32) + bpw1
    h2 = _bn_relu(h2, g2, be2)                                   # (M1, 64)

    # ---- dw_conv2 (k=3, s=2, p=1): even/odd phase split, one roll ---------
    hsplit = h2.reshape(M2, 2, 64)
    he = hsplit[:, 0, :]                                         # h2[2j]
    ho = hsplit[:, 1, :]                                         # h2[2j+1]
    j2 = lax.broadcasted_iota(jnp.int32, (M2, 1), 0) % L2
    tap0 = jnp.where(j2 == 0, 0.0,
                     pltpu.roll(ho, shift=1, axis=0))            # h2[2j-1]
    dw2 = tap0 * wdw2[0] + he * wdw2[1] + ho * wdw2[2] + bdw2

    # ---- pw_conv2 + bn3 + relu --------------------------------------------
    h3 = jnp.dot(dw2, wpw2_ref[...],
                 preferred_element_type=jnp.float32) + bpw2
    h3 = _bn_relu(h3, g3, be3)                                   # (M2, 128)

    # ---- global average pool (segment-mean matmul, stays 8-aligned) + fc --
    col = lax.broadcasted_iota(jnp.int32, (B, M2), 1)
    row = lax.broadcasted_iota(jnp.int32, (B, M2), 0)
    seg0 = row * L2
    pool = jnp.where((col >= seg0) & (col < seg0 + L2),
                     1.0 / L2, 0.0).astype(jnp.float32)          # (B, M2)
    pooled = jnp.dot(pool, h3, preferred_element_type=jnp.float32)  # (B, 128)
    out_ref[...] = jnp.dot(pooled, wfc_ref[...],
                           preferred_element_type=jnp.float32) + bfc


def init_params(key):
    ks = jax.random.split(key, 18)

    def n(k, shape, scale=0.1):
        return scale * jax.random.normal(k, shape, dtype=jnp.float32)

    # conv1: Conv1d(3, 32, k=3, s=2, p=1) -> (9, 32), row = k*3 + c
    w1 = n(ks[0], (9, 32))
    b1 = n(ks[1], (32,))
    g1 = 1.0 + n(ks[2], (32,)); be1 = n(ks[3], (32,))
    # dw_conv1: Conv1d(32, 32, k=3, groups=32, s=1, p=1) -> (3, 32)
    wdw1 = n(ks[4], (3, 32)); bdw1 = n(ks[5], (32,))
    # pw_conv1: Conv1d(32, 64, k=1) -> (32, 64)
    wpw1 = n(ks[6], (32, 64)); bpw1 = n(ks[7], (64,))
    g2 = 1.0 + n(ks[8], (64,)); be2 = n(ks[9], (64,))
    # dw_conv2: Conv1d(64, 64, k=3, groups=64, s=2, p=1) -> (3, 64)
    wdw2 = n(ks[10], (3, 64)); bdw2 = n(ks[11], (64,))
    # pw_conv2: Conv1d(64, 128, k=1) -> (64, 128)
    wpw2 = n(ks[12], (64, 128)); bpw2 = n(ks[13], (128,))
    g3 = 1.0 + n(ks[14], (128,)); be3 = n(ks[15], (128,))
    # fc: Linear(128, 2) -> (128, 2)
    wfc = n(ks[16], (128, 2)); bfc = n(ks[17], (2,))

    # Pack every per-channel vector + the depthwise weights into one (18, 128)
    # slab: a single DMA / VMEM tile instead of ~14 sub-(8,128) arguments.
    pvec = jnp.zeros((18, 128), jnp.float32)
    rows = [b1, g1, be1, bdw1, bpw1, g2, be2, bdw2, bpw2, g3, be3, bfc,
            wdw1[0], wdw1[1], wdw1[2], wdw2[0], wdw2[1], wdw2[2]]
    for r, v in enumerate(rows):
        pvec = pvec.at[r, :v.shape[0]].set(v)

    return dict(w1=w1, wpw1=wpw1, wpw2=wpw2, wfc=wfc, pvec=pvec)


def mobilenet1d_forward(x_ncl, params):
    # x_ncl: (B, 3, L) float32 (PyTorch NCL layout)
    x = jnp.transpose(x_ncl, (0, 2, 1)).astype(jnp.float32)     # (B, L, 3)
    B, L, _ = x.shape
    L1 = (L + 2 - 3) // 2 + 1                                   # conv1 out len
    # TODO(synk): odd L1 needs one extra zero row per batch before the
    # even/odd phase split in dw_conv2; not required for these sizes.
    assert L1 % 2 == 0, "kernel assumes an even conv1 output length"
    xp = jnp.pad(x, ((0, 0), (1, 1), (0, 0)))                   # (B, L+2, 3)

    # im2col for conv1 (k=3, s=2): lane index = k*3 + c, matching w1's rows.
    taps = [xp[:, k::2, :][:, :L1, :] for k in range(3)]        # 3 x (B, L1, 3)
    xcol = jnp.concatenate(taps, axis=-1).reshape(B * L1, 9)    # (B*L1, 9)

    args = (xcol, params['w1'], params['wpw1'], params['wpw2'],
            params['wfc'], params['pvec'])

    return pl.pallas_call(
        mobilenet1d_kernel,
        out_shape=jax.ShapeDtypeStruct((B, 2), jnp.float32),
        in_specs=[pl.BlockSpec(memory_space=pltpu.MemorySpace.VMEM)] * len(args),
        out_specs=pl.BlockSpec(memory_space=pltpu.MemorySpace.VMEM),
    )(*args)


if __name__ == "__main__":
    key = jax.random.PRNGKey(0)
    k_x, k_p = jax.random.split(key)
    B, C_in, L = 2, 3, 16
    x = jax.random.normal(k_x, (B, C_in, L), dtype=jnp.float32)
    params = init_params(k_p)

    fwd = jax.jit(mobilenet1d_forward)
    logits = fwd(x, params)
    jax.block_until_ready(logits)
    assert logits.shape == (B, 2), logits.shape
    print("KERNEL_OK")
</pallas_src>

<mosaic_0001>
module attributes {stable_mosaic.version = 11 : i64} {
  func.func @mobilenet1d_kernel(%arg0: memref<16x9xf32, #tpu.memory_space<vmem>>, %arg1: memref<9x32xf32, #tpu.memory_space<vmem>>, %arg2: memref<32x64xf32, #tpu.memory_space<vmem>>, %arg3: memref<64x128xf32, #tpu.memory_space<vmem>>, %arg4: memref<128x2xf32, #tpu.memory_space<vmem>>, %arg5: memref<18x128xf32, #tpu.memory_space<vmem>>, %arg6: memref<2x2xf32, #tpu.memory_space<vmem>>) attributes {dimension_semantics = [], scalar_prefetch = 0 : i64, scratch_operands = 0 : i64, tpu.core_type = #tpu.core_type<tc>} {
    %c0 = arith.constant 0 : index
    %c0_0 = arith.constant 0 : index
    %0 = vector.load %arg5[%c0, %c0_0] : memref<18x128xf32, #tpu.memory_space<vmem>>, vector<1x32xf32>
    %c1 = arith.constant 1 : index
    %c0_1 = arith.constant 0 : index
    %1 = vector.load %arg5[%c1, %c0_1] : memref<18x128xf32, #tpu.memory_space<vmem>>, vector<1x32xf32>
    %c2 = arith.constant 2 : index
    %c0_2 = arith.constant 0 : index
    %2 = vector.load %arg5[%c2, %c0_2] : memref<18x128xf32, #tpu.memory_space<vmem>>, vector<1x32xf32>
    %c3 = arith.constant 3 : index
    %c0_3 = arith.constant 0 : index
    %3 = vector.load %arg5[%c3, %c0_3] : memref<18x128xf32, #tpu.memory_space<vmem>>, vector<1x32xf32>
    %c4 = arith.constant 4 : index
    %c0_4 = arith.constant 0 : index
    %4 = vector.load %arg5[%c4, %c0_4] : memref<18x128xf32, #tpu.memory_space<vmem>>, vector<1x64xf32>
    %c5 = arith.constant 5 : index
    %c0_5 = arith.constant 0 : index
    %5 = vector.load %arg5[%c5, %c0_5] : memref<18x128xf32, #tpu.memory_space<vmem>>, vector<1x64xf32>
    %c6 = arith.constant 6 : index
    %c0_6 = arith.constant 0 : index
    %6 = vector.load %arg5[%c6, %c0_6] : memref<18x128xf32, #tpu.memory_space<vmem>>, vector<1x64xf32>
    %c7 = arith.constant 7 : index
    %c0_7 = arith.constant 0 : index
    %7 = vector.load %arg5[%c7, %c0_7] : memref<18x128xf32, #tpu.memory_space<vmem>>, vector<1x64xf32>
    %c8 = arith.constant 8 : index
    %c0_8 = arith.constant 0 : index
    %8 = vector.load %arg5[%c8, %c0_8] : memref<18x128xf32, #tpu.memory_space<vmem>>, vector<1x128xf32>
    %c9 = arith.constant 9 : index
    %c0_9 = arith.constant 0 : index
    %9 = vector.load %arg5[%c9, %c0_9] : memref<18x128xf32, #tpu.memory_space<vmem>>, vector<1x128xf32>
    %c10 = arith.constant 10 : index
    %c0_10 = arith.constant 0 : index
    %10 = vector.load %arg5[%c10, %c0_10] : memref<18x128xf32, #tpu.memory_space<vmem>>, vector<1x128xf32>
    %c11 = arith.constant 11 : index
    %c0_11 = arith.constant 0 : index
    %11 = vector.load %arg5[%c11, %c0_11] : memref<18x128xf32, #tpu.memory_space<vmem>>, vector<1x2xf32>
    %c12 = arith.constant 12 : index
    %c0_12 = arith.constant 0 : index
    %12 = vector.load %arg5[%c12, %c0_12] : memref<18x128xf32, #tpu.memory_space<vmem>>, vector<1x32xf32>
    %c13 = arith.constant 13 : index
    %c0_13 = arith.constant 0 : index
    %13 = vector.load %arg5[%c13, %c0_13] : memref<18x128xf32, #tpu.memory_space<vmem>>, vector<1x32xf32>
    %c14 = arith.constant 14 : index
    %c0_14 = arith.constant 0 : index
    %14 = vector.load %arg5[%c14, %c0_14] : memref<18x128xf32, #tpu.memory_space<vmem>>, vector<1x32xf32>
    %c15 = arith.constant 15 : index
    %c0_15 = arith.constant 0 : index
    %15 = vector.load %arg5[%c15, %c0_15] : memref<18x128xf32, #tpu.memory_space<vmem>>, vector<1x64xf32>
    %c16 = arith.constant 16 : index
    %c0_16 = arith.constant 0 : index
    %16 = vector.load %arg5[%c16, %c0_16] : memref<18x128xf32, #tpu.memory_space<vmem>>, vector<1x64xf32>
    %c17 = arith.constant 17 : index
    %c0_17 = arith.constant 0 : index
    %17 = vector.load %arg5[%c17, %c0_17] : memref<18x128xf32, #tpu.memory_space<vmem>>, vector<1x64xf32>
    %c0_18 = arith.constant 0 : index
    %c0_19 = arith.constant 0 : index
    %18 = vector.load %arg0[%c0_18, %c0_19] : memref<16x9xf32, #tpu.memory_space<vmem>>, vector<16x9xf32>
    %c0_20 = arith.constant 0 : index
    %c0_21 = arith.constant 0 : index
    %19 = vector.load %arg1[%c0_20, %c0_21] : memref<9x32xf32, #tpu.memory_space<vmem>>, vector<9x32xf32>
    %cst = arith.constant dense<0.000000e+00> : vector<16x32xf32>
    %20 = tpu.matmul %18, %19, %cst {dimension_numbers = #tpu.dot_dimension_numbers<[1], [0], [0], [1], [0, 0, 1, 1], [], []>} : vector<16x9xf32>, vector<9x32xf32>, vector<16x32xf32> -> vector<16x32xf32>
    %21 = vector.broadcast %0 : vector<1x32xf32> to vector<16x32xf32>
    %22 = arith.addf %20, %21 : vector<16x32xf32>
    %cst_22 = arith.constant dense<0.000000e+00> : vector<32xf32>
    %23 = vector.multi_reduction <add>, %22, %cst_22 [0] : vector<16x32xf32> to vector<32xf32>
    %24 = vector.shape_cast %23 : vector<32xf32> to vector<1x32xf32>
    %cst_23 = arith.constant 6.250000e-02 : f32
    %25 = vector.broadcast %cst_23 : f32 to vector<1x32xf32>
    %26 = arith.mulf %24, %25 : vector<1x32xf32>
    %27 = arith.mulf %22, %22 : vector<16x32xf32>
    %cst_24 = arith.constant dense<0.000000e+00> : vector<32xf32>
    %28 = vector.multi_reduction <add>, %27, %cst_24 [0] : vector<16x32xf32> to vector<32xf32>
    %29 = vector.shape_cast %28 : vector<32xf32> to vector<1x32xf32>
    %cst_25 = arith.constant 6.250000e-02 : f32
    %30 = vector.broadcast %cst_25 : f32 to vector<1x32xf32>
    %31 = arith.mulf %29, %30 : vector<1x32xf32>
    %32 = arith.mulf %26, %26 : vector<1x32xf32>
    %33 = arith.subf %31, %32 : vector<1x32xf32>
    %34 = vector.broadcast %26 : vector<1x32xf32> to vector<16x32xf32>
    %35 = arith.subf %22, %34 : vector<16x32xf32>
    %cst_26 = arith.constant 9.99999974E-6 : f32
    %36 = vector.broadcast %cst_26 : f32 to vector<1x32xf32>
    %37 = arith.addf %33, %36 : vector<1x32xf32>
    %38 = math.rsqrt %37 : vector<1x32xf32>
    %39 = vector.broadcast %38 : vector<1x32xf32> to vector<16x32xf32>
    %40 = arith.mulf %35, %39 : vector<16x32xf32>
    %41 = vector.broadcast %1 : vector<1x32xf32> to vector<16x32xf32>
    %42 = arith.mulf %40, %41 : vector<16x32xf32>
    %43 = vector.broadcast %2 : vector<1x32xf32> to vector<16x32xf32>
    %44 = arith.addf %42, %43 : vector<16x32xf32>
    %cst_27 = arith.constant 0.000000e+00 : f32
    %45 = vector.broadcast %cst_27 : f32 to vector<16x32xf32>
    %46 = arith.maximumf %44, %45 : vector<16x32xf32>
    %47 = tpu.iota {dimensions = array<i32: 0>} : vector<16x1xi32>
    %c8_i32 = arith.constant 8 : i32
    %c0_i32 = arith.constant 0 : i32
    %48 = arith.cmpi eq, %c8_i32, %c0_i32 : i32
    %c1_i32 = arith.constant 1 : i32
    %49 = arith.select %48, %c1_i32, %c8_i32 : i32
    %50 = vector.broadcast %49 : i32 to vector<16x1xi32>
    %51 = arith.remsi %47, %50 : vector<16x1xi32>
    %c0_i32_28 = arith.constant 0 : i32
    %52 = vector.broadcast %c0_i32_28 : i32 to vector<16x1xi32>
    %53 = arith.cmpi ne, %51, %52 : vector<16x1xi32>
    %c0_i32_29 = arith.constant 0 : i32
    %54 = vector.broadcast %c0_i32_29 : i32 to vector<16x1xi32>
    %55 = arith.cmpi slt, %51, %54 : vector<16x1xi32>
    %c0_i32_30 = arith.constant 0 : i32
    %56 = arith.cmpi slt, %49, %c0_i32_30 : i32
    %57 = vector.broadcast %56 : i1 to vector<16x1xi1>
    %58 = vector.broadcast %57 : vector<16x1xi1> to vector<16x1xi1>
    %59 = arith.xori %55, %58 : vector<16x1xi1>
    %60 = arith.andi %59, %53 : vector<16x1xi1>
    %61 = vector.broadcast %49 : i32 to vector<16x1xi32>
    %62 = arith.addi %51, %61 : vector<16x1xi32>
    %63 = arith.select %60, %62, %51 : vector<16x1xi1>, vector<16x1xi32>
    %c0_i32_31 = arith.constant 0 : i32
    %64 = vector.broadcast %c0_i32_31 : i32 to vector<16x1xi32>
    %65 = arith.cmpi eq, %63, %64 : vector<16x1xi32>
    %c1_i32_32 = arith.constant 1 : i32
    %66 = tpu.dynamic_rotate %46 by %c1_i32_32 dim 0 : vector<16x32xf32>, i32 -> vector<16x32xf32>
    %cst_33 = arith.constant 0.000000e+00 : f32
    %67 = vector.shape_cast %65 : vector<16x1xi1> to vector<16x1xi1>
    %68 = vector.broadcast %67 : vector<16x1xi1> to vector<16x32xi1>
    %69 = vector.broadcast %cst_33 : f32 to vector<16x32xf32>
    %70 = arith.select %68, %69, %66 : vector<16x32xi1>, vector<16x32xf32>
    %c7_i32 = arith.constant 7 : i32
    %71 = vector.broadcast %c7_i32 : i32 to vector<16x1xi32>
    %72 = arith.cmpi eq, %63, %71 : vector<16x1xi32>
    %c15_i32 = arith.constant 15 : i32
    %73 = tpu.dynamic_rotate %46 by %c15_i32 dim 0 : vector<16x32xf32>, i32 -> vector<16x32xf32>
    %cst_34 = arith.constant 0.000000e+00 : f32
    %74 = vector.shape_cast %72 : vector<16x1xi1> to vector<16x1xi1>
    %75 = vector.broadcast %74 : vector<16x1xi1> to vector<16x32xi1>
    %76 = vector.broadcast %cst_34 : f32 to vector<16x32xf32>
    %77 = arith.select %75, %76, %73 : vector<16x32xi1>, vector<16x32xf32>
    %78 = vector.broadcast %12 : vector<1x32xf32> to vector<16x32xf32>
    %79 = arith.mulf %70, %78 : vector<16x32xf32>
    %80 = vector.broadcast %13 : vector<1x32xf32> to vector<16x32xf32>
    %81 = arith.mulf %46, %80 : vector<16x32xf32>
    %82 = arith.addf %79, %81 : vector<16x32xf32>
    %83 = vector.broadcast %14 : vector<1x32xf32> to vector<16x32xf32>
    %84 = arith.mulf %77, %83 : vector<16x32xf32>
    %85 = arith.addf %82, %84 : vector<16x32xf32>
    %86 = vector.broadcast %3 : vector<1x32xf32> to vector<16x32xf32>
    %87 = arith.addf %85, %86 : vector<16x32xf32>
    %c0_35 = arith.constant 0 : index
    %c0_36 = arith.constant 0 : index
    %88 = vector.load %arg2[%c0_35, %c0_36] : memref<32x64xf32, #tpu.memory_space<vmem>>, vector<32x64xf32>
    %cst_37 = arith.constant dense<0.000000e+00> : vector<16x64xf32>
    %89 = tpu.matmul %87, %88, %cst_37 {dimension_numbers = #tpu.dot_dimension_numbers<[1], [0], [0], [1], [0, 0, 1, 1], [], []>} : vector<16x32xf32>, vector<32x64xf32>, vector<16x64xf32> -> vector<16x64xf32>
    %90 = vector.broadcast %4 : vector<1x64xf32> to vector<16x64xf32>
    %91 = arith.addf %89, %90 : vector<16x64xf32>
    %cst_38 = arith.constant dense<0.000000e+00> : vector<64xf32>
    %92 = vector.multi_reduction <add>, %91, %cst_38 [0] : vector<16x64xf32> to vector<64xf32>
    %93 = vector.shape_cast %92 : vector<64xf32> to vector<1x64xf32>
    %cst_39 = arith.constant 6.250000e-02 : f32
    %94 = vector.broadcast %cst_39 : f32 to vector<1x64xf32>
    %95 = arith.mulf %93, %94 : vector<1x64xf32>
    %96 = arith.mulf %91, %91 : vector<16x64xf32>
    %cst_40 = arith.constant dense<0.000000e+00> : vector<64xf32>
    %97 = vector.multi_reduction <add>, %96, %cst_40 [0] : vector<16x64xf32> to vector<64xf32>
    %98 = vector.shape_cast %97 : vector<64xf32> to vector<1x64xf32>
    %cst_41 = arith.constant 6.250000e-02 : f32
    %99 = vector.broadcast %cst_41 : f32 to vector<1x64xf32>
    %100 = arith.mulf %98, %99 : vector<1x64xf32>
    %101 = arith.mulf %95, %95 : vector<1x64xf32>
    %102 = arith.subf %100, %101 : vector<1x64xf32>
    %103 = vector.broadcast %95 : vector<1x64xf32> to vector<16x64xf32>
    %104 = arith.subf %91, %103 : vector<16x64xf32>
    %cst_42 = arith.constant 9.99999974E-6 : f32
    %105 = vector.broadcast %cst_42 : f32 to vector<1x64xf32>
    %106 = arith.addf %102, %105 : vector<1x64xf32>
    %107 = math.rsqrt %106 : vector<1x64xf32>
    %108 = vector.broadcast %107 : vector<1x64xf32> to vector<16x64xf32>
    %109 = arith.mulf %104, %108 : vector<16x64xf32>
    %110 = vector.broadcast %5 : vector<1x64xf32> to vector<16x64xf32>
    %111 = arith.mulf %109, %110 : vector<16x64xf32>
    %112 = vector.broadcast %6 : vector<1x64xf32> to vector<16x64xf32>
    %113 = arith.addf %111, %112 : vector<16x64xf32>
    %cst_43 = arith.constant 0.000000e+00 : f32
    %114 = vector.broadcast %cst_43 : f32 to vector<16x64xf32>
    %115 = arith.maximumf %113, %114 : vector<16x64xf32>
    %116 = vector.shape_cast %115 : vector<16x64xf32> to vector<8x2x64xf32>
    %117 = vector.extract_strided_slice %116 {offsets = [0, 0, 0], sizes = [8, 1, 64], strides = [1, 1, 1]} : vector<8x2x64xf32> to vector<8x1x64xf32>
    %118 = vector.shape_cast %117 : vector<8x1x64xf32> to vector<8x64xf32>
    %119 = vector.extract_strided_slice %116 {offsets = [0, 1, 0], sizes = [8, 1, 64], strides = [1, 1, 1]} : vector<8x2x64xf32> to vector<8x1x64xf32>
    %120 = vector.shape_cast %119 : vector<8x1x64xf32> to vector<8x64xf32>
    %121 = tpu.iota {dimensions = array<i32: 0>} : vector<8x1xi32>
    %c4_i32 = arith.constant 4 : i32
    %c0_i32_44 = arith.constant 0 : i32
    %122 = arith.cmpi eq, %c4_i32, %c0_i32_44 : i32
    %c1_i32_45 = arith.constant 1 : i32
    %123 = arith.select %122, %c1_i32_45, %c4_i32 : i32
    %124 = vector.broadcast %123 : i32 to vector<8x1xi32>
    %125 = arith.remsi %121, %124 : vector<8x1xi32>
    %c0_i32_46 = arith.constant 0 : i32
    %126 = vector.broadcast %c0_i32_46 : i32 to vector<8x1xi32>
    %127 = arith.cmpi ne, %125, %126 : vector<8x1xi32>
    %c0_i32_47 = arith.constant 0 : i32
    %128 = vector.broadcast %c0_i32_47 : i32 to vector<8x1xi32>
    %129 = arith.cmpi slt, %125, %128 : vector<8x1xi32>
    %c0_i32_48 = arith.constant 0 : i32
    %130 = arith.cmpi slt, %123, %c0_i32_48 : i32
    %131 = vector.broadcast %130 : i1 to vector<8x1xi1>
    %132 = vector.broadcast %131 : vector<8x1xi1> to vector<8x1xi1>
    %133 = arith.xori %129, %132 : vector<8x1xi1>
    %134 = arith.andi %133, %127 : vector<8x1xi1>
    %135 = vector.broadcast %123 : i32 to vector<8x1xi32>
    %136 = arith.addi %125, %135 : vector<8x1xi32>
    %137 = arith.select %134, %136, %125 : vector<8x1xi1>, vector<8x1xi32>
    %c0_i32_49 = arith.constant 0 : i32
    %138 = vector.broadcast %c0_i32_49 : i32 to vector<8x1xi32>
    %139 = arith.cmpi eq, %137, %138 : vector<8x1xi32>
    %c1_i32_50 = arith.constant 1 : i32
    %140 = tpu.dynamic_rotate %120 by %c1_i32_50 dim 0 : vector<8x64xf32>, i32 -> vector<8x64xf32>
    %cst_51 = arith.constant 0.000000e+00 : f32
    %141 = vector.shape_cast %139 : vector<8x1xi1> to vector<8x1xi1>
    %142 = vector.broadcast %141 : vector<8x1xi1> to vector<8x64xi1>
    %143 = vector.broadcast %cst_51 : f32 to vector<8x64xf32>
    %144 = arith.select %142, %143, %140 : vector<8x64xi1>, vector<8x64xf32>
    %145 = vector.broadcast %15 : vector<1x64xf32> to vector<8x64xf32>
    %146 = arith.mulf %144, %145 : vector<8x64xf32>
    %147 = vector.broadcast %16 : vector<1x64xf32> to vector<8x64xf32>
    %148 = arith.mulf %118, %147 : vector<8x64xf32>
    %149 = arith.addf %146, %148 : vector<8x64xf32>
    %150 = vector.broadcast %17 : vector<1x64xf32> to vector<8x64xf32>
    %151 = arith.mulf %120, %150 : vector<8x64xf32>
    %152 = arith.addf %149, %151 : vector<8x64xf32>
    %153 = vector.broadcast %7 : vector<1x64xf32> to vector<8x64xf32>
    %154 = arith.addf %152, %153 : vector<8x64xf32>
    %c0_52 = arith.constant 0 : index
    %c0_53 = arith.constant 0 : index
    %155 = vector.load %arg3[%c0_52, %c0_53] : memref<64x128xf32, #tpu.memory_space<vmem>>, vector<64x128xf32>
    %cst_54 = arith.constant dense<0.000000e+00> : vector<8x128xf32>
    %156 = tpu.matmul %154, %155, %cst_54 {dimension_numbers = #tpu.dot_dimension_numbers<[1], [0], [0], [1], [0, 0, 1, 1], [], []>} : vector<8x64xf32>, vector<64x128xf32>, vector<8x128xf32> -> vector<8x128xf32>
    %157 = vector.broadcast %8 : vector<1x128xf32> to vector<8x128xf32>
    %158 = arith.addf %156, %157 : vector<8x128xf32>
    %cst_55 = arith.constant dense<0.000000e+00> : vector<128xf32>
    %159 = vector.multi_reduction <add>, %158, %cst_55 [0] : vector<8x128xf32> to vector<128xf32>
    %160 = vector.shape_cast %159 : vector<128xf32> to vector<1x128xf32>
    %cst_56 = arith.constant 1.250000e-01 : f32
    %161 = vector.broadcast %cst_56 : f32 to vector<1x128xf32>
    %162 = arith.mulf %160, %161 : vector<1x128xf32>
    %163 = arith.mulf %158, %158 : vector<8x128xf32>
    %cst_57 = arith.constant dense<0.000000e+00> : vector<128xf32>
    %164 = vector.multi_reduction <add>, %163, %cst_57 [0] : vector<8x128xf32> to vector<128xf32>
    %165 = vector.shape_cast %164 : vector<128xf32> to vector<1x128xf32>
    %cst_58 = arith.constant 1.250000e-01 : f32
    %166 = vector.broadcast %cst_58 : f32 to vector<1x128xf32>
    %167 = arith.mulf %165, %166 : vector<1x128xf32>
    %168 = arith.mulf %162, %162 : vector<1x128xf32>
    %169 = arith.subf %167, %168 : vector<1x128xf32>
    %170 = vector.broadcast %162 : vector<1x128xf32> to vector<8x128xf32>
    %171 = arith.subf %158, %170 : vector<8x128xf32>
    %cst_59 = arith.constant 9.99999974E-6 : f32
    %172 = vector.broadcast %cst_59 : f32 to vector<1x128xf32>
    %173 = arith.addf %169, %172 : vector<1x128xf32>
    %174 = math.rsqrt %173 : vector<1x128xf32>
    %175 = vector.broadcast %174 : vector<1x128xf32> to vector<8x128xf32>
    %176 = arith.mulf %171, %175 : vector<8x128xf32>
    %177 = vector.broadcast %9 : vector<1x128xf32> to vector<8x128xf32>
    %178 = arith.mulf %176, %177 : vector<8x128xf32>
    %179 = vector.broadcast %10 : vector<1x128xf32> to vector<8x128xf32>
    %180 = arith.addf %178, %179 : vector<8x128xf32>
    %cst_60 = arith.constant 0.000000e+00 : f32
    %181 = vector.broadcast %cst_60 : f32 to vector<8x128xf32>
    %182 = arith.maximumf %180, %181 : vector<8x128xf32>
    %183 = tpu.iota {dimensions = array<i32: 1>} : vector<2x8xi32>
    %184 = tpu.iota {dimensions = array<i32: 0>} : vector<2x8xi32>
    %c4_i32_61 = arith.constant 4 : i32
    %185 = vector.broadcast %c4_i32_61 : i32 to vector<2x8xi32>
    %186 = arith.muli %184, %185 : vector<2x8xi32>
    %187 = arith.cmpi sge, %183, %186 : vector<2x8xi32>
    %c4_i32_62 = arith.constant 4 : i32
    %188 = vector.broadcast %c4_i32_62 : i32 to vector<2x8xi32>
    %189 = arith.addi %186, %188 : vector<2x8xi32>
    %190 = arith.cmpi slt, %183, %189 : vector<2x8xi32>
    %191 = arith.andi %187, %190 : vector<2x8xi1>
    %cst_63 = arith.constant 2.500000e-01 : f32
    %cst_64 = arith.constant 0.000000e+00 : f32
    %192 = vector.broadcast %cst_63 : f32 to vector<2x8xf32>
    %193 = vector.broadcast %cst_64 : f32 to vector<2x8xf32>
    %194 = arith.select %191, %192, %193 : vector<2x8xi1>, vector<2x8xf32>
    %cst_65 = arith.constant dense<0.000000e+00> : vector<2x128xf32>
    %195 = tpu.matmul %194, %182, %cst_65 {dimension_numbers = #tpu.dot_dimension_numbers<[1], [0], [0], [1], [0, 0, 1, 1], [], []>} : vector<2x8xf32>, vector<8x128xf32>, vector<2x128xf32> -> vector<2x128xf32>
    %c0_66 = arith.constant 0 : index
    %c0_67 = arith.constant 0 : index
    %196 = vector.load %arg4[%c0_66, %c0_67] : memref<128x2xf32, #tpu.memory_space<vmem>>, vector<128x2xf32>
    %cst_68 = arith.constant dense<0.000000e+00> : vector<2x2xf32>
    %197 = tpu.matmul %195, %196, %cst_68 {dimension_numbers = #tpu.dot_dimension_numbers<[1], [0], [0], [1], [0, 0, 1, 1], [], []>} : vector<2x128xf32>, vector<128x2xf32>, vector<2x2xf32> -> vector<2x2xf32>
    %198 = vector.broadcast %11 : vector<1x2xf32> to vector<2x2xf32>
    %199 = arith.addf %197, %198 : vector<2x2xf32>
    %c0_69 = arith.constant 0 : index
    %c0_70 = arith.constant 0 : index
    %200 = vector.load %arg6[%c0_69, %c0_70] : memref<2x2xf32, #tpu.memory_space<vmem>>, vector<2x2xf32>
    tpu.vector_store %arg6[%c0_69, %c0_70], %199 {strides = array<i32>} : memref<2x2xf32, #tpu.memory_space<vmem>>, vector<2x2xf32>,
    return
  }
}

</mosaic_0001>

<bundles_post_ra>
// kernel: mobilenet1d_forward.1
= control target key start
LH: loop header
LB: loop body
LE: loop exit
PB: predicated region body
PF: predicated region fallthrough
CT: control target
= control target key end

     0   :  { %vm57_vm0 = vcmask 1040384   ;;  %vm1227_vm1 = vmmov 1   ;;  %vm50_vm3 = vcmask 72704   ;;  %s1579_s0 = inlined_call_operand.vmem [shape: f32[16,9], index: 0, kind: input, shape index: {}]   ;;  %s1580_s1 = inlined_call_operand.vmem [shape: f32[9,32], index: 1, kind: input, shape index: {}]   ;;  %s1581_s2 = inlined_call_operand.vmem [shape: f32[32,64], index: 2, kind: input, shape index: {}]   ;;  %s1582_s3 = inlined_call_operand.vmem [shape: f32[64,128], index: 3, kind: input, shape index: {}]   ;;  %s1583_s4 = inlined_call_operand.vmem [shape: f32[128,2], index: 4, kind: input, shape index: {}]   ;;  %s1584_s5 = inlined_call_operand.vmem [shape: f32[18,128], index: 5, kind: input, shape index: {}]   ;;  %s1585_s6 = inlined_call_operand.hbm [shape: f32[2,2], index: 6, kind: output, shape index: {}]  }
   0x1   :  { %v44_v0 = vld [vmem:[%s1580_s1] sm:$0xff]  ;;  %v45_v1 = vld [vmem:[%s1580_s1 + $0x8] sm:$0x1]  ;;  %vm1142_vm2 = vmpackc.low %vm57_vm0, %vm1227_vm1 }
   0x2   :  { %v42_v2 = vld [vmem:[%s1579_s0] sm:$0xff]  ;;  %v1141_v3 = vpack.c.bf16 %v45_v1, %v44_v0 }
   0x3   :  { %1068 = vmatprep.mubr.msk.f32.mxu0 %vm50_vm3, %v42_v2 }
   0x4   :  { %11 = vsyncpa [#allocation3], 0  ;;  %1143 = vmatprep.subr.msk.bf16.mxu0 %vm1142_vm2, %v1141_v3  ;;  %v43_v4 = vld [vmem:[%s1579_s0 + $0x8] sm:$0xff]  ;;  %v262_v5 = vld [vmem:[%s1581_s2] sm:$0xff]  ;;  %vm136_vm4 = vcmask 261120   ;;  %v181_v43 = vlaneseq  ;;  %vm1229_vm11 = vmmov 0  }
   0x5   :  { %1146 = vmatpush3.bf16.msk.msra.mxu0 %vm1142_vm2, %v1141_v3  ;;  %v263_v6 = vld [vmem:[%s1581_s2 + $0x8] sm:$0xff]  ;;  %v264_v7 = vld [vmem:[%s1581_s2 + $0x10] sm:$0xff]  ;;  %v265_v9 = vld [vmem:[%s1581_s2 + $0x18] sm:$0xff]  ;;  %vm351_vm12 = vcmask 523264   ;;  %vm485_vm13 = vcmask 1041409   ;;  %vm487_vm14 = vcmask 1042434  }
   0x6   :  { %v1147_v8 = vpack.c.bf16 %v263_v6, %v262_v5  ;;  %v1151_v10 = vpack.c.bf16 %v265_v9, %v264_v7  ;;  %v1001_v11 = vld [vmem:[%s1584_s5] ss:$0 sm:$0xff]  ;;  %v1300_v44 = vshrl.u32 %v181_v43, 7  ;;  %v1005_v46 = vld [vmem:[%s1584_s5 + $0x1] ss:$0 sm:$0xff]  ;;  %vm489_vm15 = vcmask 1043459  }
   0x7   :  { %v1006_v50 = vld [vmem:[%s1584_s5 + $0x2] ss:$0 sm:$0xff]  ;;  %v1007_v3 = vld [vmem:[%s1584_s5 + $0xc] ss:$0 sm:$0xff]  ;;  %v1009_v9 = vld [vmem:[%s1584_s5 + $0xe] ss:$0 sm:$0xff] }
   0x8   :  { %1069 = vmatmul.mubr.msk.f32.vlgmr.msra.gmra.mrb[0].mxu0 %vm50_vm3, %v43_v4  ;;  %1148 = vmatprep.subr.bf16.mxu0 %v1147_v8  ;;  %v183_v47 = vadd.s32 8, %v1300_v44  ;;  %v188_v53 = vand.u32 7, %v1300_v44  ;;  %vm212_vm5 = vcmp.lt.s32.totalorder %v1300_v44, 1  ;;  %vm225_vm6 = vcmp.lt.s32.totalorder %v1300_v44, 7  ;;  %v1008_v4 = vld [vmem:[%s1584_s5 + $0xd] ss:$0 sm:$0xff] }
   0x9   :  { %1150 = vmatpush3.bf16.msra.mxu0 %v1147_v8  ;;  %vm491_vm0 = vcmask 1044484   ;;  %vm493_vm1 = vcmask 1045509   ;;  %vm495_vm2 = vcmask 1046534   ;;  %vm497_vm3 = vcmask 1047559   ;;  %s1232_s0 = smov [#allocation2]  }
   0xa   :  { %1152 = vmatprep.subr.bf16.mxu0 %v1151_v10  ;;  %v195_v54 = vand.u32 7, %v183_v47  ;;  %vm1312_vm7 = vcmp.eq.s32.totalorder %v188_v53, 0  ;;  %vm1320_vm9 = vcmp.eq.s32.totalorder %v188_v53, 7  ;;  %s993_s12 = sshll.u32 %s1232_s0, 4  ;;  %s994_s12 = int_to_ptr.vmem [resolvable:$true] %s993_s12 }
   0xb   :  { %s1203_s2 = scalar_lea.vmem %s994_s12, 32  ;;  %p1208_p1 = scmp.lt.s32.totalorder %s994_s12, %s994_s12 }
   0xc   :  { %vm1316_vm8 = vcmp.eq.s32.totalorder %v195_v54, 0  ;;  %vm1324_vm10 = vcmp.eq.s32.totalorder %v195_v54, 7  ;;  %p1204_p0 = scmp.ne.s32.totalorder %s994_s12, %s1203_s2  ;;  %p1209_p2 = scmp.lt.s32.totalorder %s1203_s2, %s1203_s2 }
   0xd   :  { %1154 = vmatpush3.bf16.msra.mxu0 %v1151_v10 }
   0xe   :  { %p1210_p3 = por %p1209_p2, %p1208_p1 }
  0x10   :  { %p1211_p4 = pnand %p1210_p3, %p1204_p0 }
  0xdb   :  { %v1070_v12 = vpop.f32.mrb[0].mxu0 }
  0xdc   :  { %v133_v13 = vadd.f32 %v1070_v12, %v1001_v11  ;;  %v127_v14 = vpop.f32.mrb[1].mxu0 }
  0xdd   :  { %v128_v15 = vadd.f32 %v1001_v11, %v127_v14 }
  0xde   :  { %v138_v16 = vsel %vm136_vm4, %v133_v13, 0.0  ;;  %v148_v17 = vmul.f32 %v133_v13, %v133_v13 }
  0xdf   :  { %v137_v18 = vsel %vm136_vm4, %v128_v15, 0.0  ;;  %v147_v19 = vmul.f32 %v128_v15, %v128_v15 }
  0xe0   :  { %v150_v20 = vsel %vm136_vm4, %v148_v17, 0.0  ;;  %v139_v21 = vadd.f32 %v138_v16, %v137_v18 }
  0xe1   :  { %v149_v22 = vsel %vm136_vm4, %v147_v19, 0.0 }
  0xe2   :  { %v140_v23 = vrot.slane %v139_v21, 4  ;;  %v151_v24 = vadd.f32 %v150_v20, %v149_v22  ;;  %v1010_v22 = vld [vmem:[%s1584_s5 + $0x3] ss:$0 sm:$0xff] }
  0xe4   :  { %v141_v25 = vadd.f32 %v140_v23, %v139_v21  ;;  %v152_v26 = vrot.slane %v151_v24, 4 }
  0xe6   :  { %v142_v27 = vrot.slane %v141_v25, 2  ;;  %v153_v28 = vadd.f32 %v152_v26, %v151_v24 }
  0xe8   :  { %v143_v29 = vadd.f32 %v142_v27, %v141_v25  ;;  %v154_v30 = vrot.slane %v153_v28, 2  ;;  %v696_v27 = vld [vmem:[%s1582_s3] sm:$0xff] }
  0xea   :  { %v144_v31 = vrot.slane %v143_v29, 1  ;;  %v155_v32 = vadd.f32 %v154_v30, %v153_v28  ;;  %v697_v28 = vld [vmem:[%s1582_s3 + $0x8] sm:$0xff]  ;;  %v1228_v30 = vmov 0.0|0.0  }
  0xeb   :  { %1155 = vmatprep.subr.bf16.mxu0 %v1228_v30  ;;  %1167 = vmatprep.subr.bf16.mxu1 %v1228_v30 }
  0xec   :  { %v145_v33 = vadd.f32 %v144_v31, %v143_v29  ;;  %v156_v34 = vrot.slane %v155_v32, 1  ;;  %v698_v29 = vld [vmem:[%s1582_s3 + $0x10] sm:$0xff]  ;;  %v1156_v31 = vpack.c.bf16 %v697_v28, %v696_v27  ;;  %v1015_v27 = vld [vmem:[%s1584_s5 + $0x6] ss:$0 sm:$0xff] }
  0xee   :  { %v146_v35 = vmul.f32 0.0625, %v145_v33  ;;  %v157_v36 = vadd.f32 %v156_v34, %v155_v32  ;;  %v699_v32 = vld [vmem:[%s1582_s3 + $0x18] sm:$0xff]  ;;  %v1230_v33 = vmov 0.0  }
  0xef   :  { %1138 = vmatprep.mubr.msk.f32.mxu1 %vm1229_vm11, %v1230_v33  ;;  %v1159_v34 = vpack.c.bf16 %v699_v32, %v698_v29 }
  0xf0   :  { %v158_v37 = vmul.f32 0.0625, %v157_v36  ;;  %v159_v38 = vmul.f32 %v146_v35, %v146_v35  ;;  %v161_v39 = vsub.f32 %v128_v15, %v146_v35  ;;  %v162_v40 = vsub.f32 %v133_v13, %v146_v35  ;;  %v700_v35 = vld [vmem:[%s1582_s3 + $0x20] sm:$0xff]  ;;  %v701_v36 = vld [vmem:[%s1582_s3 + $0x28] sm:$0xff] }
  0xf2   :  { %v160_v41 = vsub.f32 %v158_v37, %v159_v38  ;;  %v1162_v37 = vpack.c.bf16 %v701_v36, %v700_v35  ;;  %v702_v38 = vld [vmem:[%s1582_s3 + $0x30] sm:$0xff]  ;;  %v1421_v36 = vsub.s32 1, %v1300_v44 }
  0xf4   :  { %v163_v42 = vadd.f32 1e-05, %v160_v41  ;;  %v1011_v41 = vld [vmem:[%s1584_s5 + $0x4] ss:$0 sm:$0xff] }
  0xf6   :  { %1197 = vrsqrt.f32 %v163_v42 }
 0x100   :  { %v1198_v45 = vpop.eup %1197 }
 0x101   :  { %v165_v48 = vmul.f32 %v1198_v45, %v161_v39  ;;  %v166_v49 = vmul.f32 %v1198_v45, %v162_v40  ;;  %v703_v39 = vld [vmem:[%s1582_s3 + $0x38] sm:$0xff] }
 0x102   :  { %v1165_v40 = vpack.c.bf16 %v703_v39, %v702_v38 }
 0x103   :  { %v171_v51 = vmul.f32 %v1005_v46, %v165_v48  ;;  %v172_v52 = vmul.f32 %v1005_v46, %v166_v49 }
 0x105   :  { %v177_v55 = vadd.f32 %v1006_v50, %v171_v51  ;;  %v178_v56 = vadd.f32 %v1006_v50, %v172_v52 }
 0x107   :  { %v179_v57 = vmax.f32 %v177_v55, 0.0  ;;  %v180_v58 = vmax.f32 %v178_v56, 0.0 }
 0x109   :  { %v210_v63 = vrot.slane %v179_v57, 7  ;;  %v211_v0 = vrot.slane %v180_v58, 7  ;;  %v223_v1 = vrot.slane %v179_v57, 1  ;;  %v224_v2 = vrot.slane %v180_v58, 1 }
 0x10a   :  { %v244_v16 = vmul.f32 %v1008_v4, %v179_v57  ;;  %v245_v17 = vmul.f32 %v1008_v4, %v180_v58 }
 0x10b   :  { %v213_v5 = vsel %vm212_vm5, %v210_v63, %v211_v0  ;;  %v214_v6 = vsel %vm212_vm5, %v211_v0, %v210_v63  ;;  %v226_v7 = vsel %vm225_vm6, %v223_v1, %v224_v2  ;;  %v227_v8 = vsel %vm225_vm6, %v224_v2, %v223_v1 }
 0x10c   :  { %v219_v10 = vsel %vm1312_vm7, 0.0, %v214_v6  ;;  %v220_v11 = vsel %vm1316_vm8, 0.0, %v213_v5  ;;  %v232_v12 = vsel %vm1320_vm9, 0.0, %v226_v7  ;;  %v233_v13 = vsel %vm1324_vm10, 0.0, %v227_v8 }
 0x10d   :  { %v238_v14 = vmul.f32 %v1007_v3, %v219_v10  ;;  %v239_v15 = vmul.f32 %v1007_v3, %v220_v11  ;;  %v252_v20 = vmul.f32 %v1009_v9, %v232_v12  ;;  %v253_v21 = vmul.f32 %v1009_v9, %v233_v13 }
 0x10e   :  { %v1231_v11 = vmov 1983009808   ;;  %vm821_vm8 = vcmask 64512   ;;  %vm985_vm9 = vcmask 9216  }
 0x10f   :  { %v246_v18 = vadd.f32 %v244_v16, %v238_v14  ;;  %v247_v19 = vadd.f32 %v245_v17, %v239_v15  ;;  %v400_v12 = vunpack.c.l.s4 %v1231_v11  ;;  %v1017_v14 = vld [vmem:[%s1584_s5 + $0x10] ss:$0 sm:$0xff]  ;;  %v1018_v15 = vld [vmem:[%s1584_s5 + $0x11] ss:$0 sm:$0xff] }
 0x110   :  { %v514_v17 = vcombine.high %v1017_v14, %v1017_v14  ;;  %v897_v11 = vld [vmem:[%s1583_s4 + $0x10] sm:$0xff] }
 0x111   :  { %v254_v23 = vadd.f32 %v252_v20, %v246_v18  ;;  %v255_v24 = vadd.f32 %v253_v21, %v247_v19  ;;  %v401_v13 = vunpack.c.0.s8 %v400_v12  ;;  %v605_v18 = vcombine.high %v1018_v15, %v1018_v15  ;;  %v1014_v21 = vld [vmem:[%s1584_s5 + $0x5] ss:$0 sm:$0xff] }
 0x113   :  { %v260_v25 = vadd.f32 %v1010_v22, %v254_v23  ;;  %v261_v26 = vadd.f32 %v1010_v22, %v255_v24  ;;  %v404_v16 = vsub.s32 %v401_v13, %v1300_v44 }
 0x115   :  { %1079 = vmatprep.mubr.msk.f32.mxu0 %vm136_vm4, %v260_v25  ;;  %v521_v19 = vrot.slane %v1017_v14, %v404_v16  ;;  %v1401_v22 = vrot.slane %v514_v17, %v404_v16  ;;  %v1403_v23 = vrot.slane %v1018_v15, %v404_v16  ;;  %v1405_v24 = vrot.slane %v605_v18, %v404_v16 }
 0x116   :  { %1080 = vmatmul.mubr.msk.f32.vlgmr.msra.gmra.mrb[2].mxu0 %vm136_vm4, %v261_v26 }
 0x117   :  { %1098 = vmatprep.mubr.msk.f32.mxu0 %vm1229_vm11, %v1230_v33  ;;  %1157 = vmatpush3.bf16.msra.mxu0 %v1156_v31  ;;  %v529_v28 = vcombine.high %v521_v19, %v521_v19  ;;  %v1412_v32 = vcombine.high %v1401_v22, %v1401_v22  ;;  %v1418_v35 = vcombine.high %v1405_v24, %v1405_v24  ;;  %v531_v39 = vrot.slane %v521_v19, 1 }
 0x118   :  { %1158 = vmatprep.subr.bf16.mxu0 %v1228_v30 }
 0x11b   :  { %1160 = vmatpush3.bf16.msra.mxu0 %v1159_v34  ;;  %v620_v34 = vcombine.high %v1403_v23, %v1403_v23 }
 0x11c   :  { %1161 = vmatprep.subr.bf16.mxu0 %v1228_v30 }
 0x11f   :  { %1163 = vmatpush3.bf16.msra.mxu0 %v1162_v37 }
 0x120   :  { %1164 = vmatprep.subr.bf16.mxu0 %v1228_v30 }
 0x123   :  { %1166 = vmatpush3.bf16.msra.mxu0 %v1165_v40  ;;  %v532_v40 = vrot.slane %v529_v28, 1 }
 0x124   :  { %1101 = vmatprep.subr.mxu0 %v1230_v33 }
 0x1e9   :  { %v1081_v42 = vpop.f32.mrb[2].mxu0 }
 0x1ea   :  { %v348_v45 = vadd.f32 %v1081_v42, %v1011_v41  ;;  %v342_v46 = vpop.f32.mrb[3].mxu0  ;;  %v622_v42 = vrot.slane %v1403_v23, 7 }
 0x1eb   :  { %v343_v47 = vadd.f32 %v1011_v41, %v342_v46  ;;  %v1424_v41 = vsub.s32 0, %v1300_v44 }
 0x1ec   :  { %v353_v48 = vsel %vm351_vm12, %v348_v45, 0.0  ;;  %v363_v49 = vmul.f32 %v348_v45, %v348_v45 }
 0x1ed   :  { %v352_v50 = vsel %vm351_vm12, %v343_v47, 0.0  ;;  %v362_v51 = vmul.f32 %v343_v47, %v343_v47 }
 0x1ee   :  { %v365_v52 = vsel %vm351_vm12, %v363_v49, 0.0  ;;  %v354_v53 = vadd.f32 %v353_v48, %v352_v50  ;;  %v623_v48 = vrot.slane %v620_v34, 7  ;;  %v533_v49 = vrot.slane %v1401_v22, 1 }
 0x1ef   :  { %v364_v54 = vsel %vm351_vm12, %v362_v51, 0.0  ;;  %v534_v50 = vrot.slane %v1412_v32, 1  ;;  %v625_v51 = vrot.slane %v1418_v35, 7 }
 0x1f0   :  { %v355_v55 = vrot.slane %v354_v53, 4  ;;  %v366_v56 = vadd.f32 %v365_v52, %v364_v54 }
 0x1f2   :  { %v356_v57 = vadd.f32 %v355_v55, %v354_v53  ;;  %v367_v58 = vrot.slane %v366_v56, 4 }
 0x1f4   :  { %v357_v59 = vrot.slane %v356_v57, 2  ;;  %v368_v60 = vadd.f32 %v367_v58, %v366_v56  ;;  %v444_v56 = vand.u32 3, %v1300_v44 }
 0x1f6   :  { %v358_v61 = vadd.f32 %v357_v59, %v356_v57  ;;  %v369_v62 = vrot.slane %v368_v60, 2  ;;  %vm1440_vm4 = vcmp.eq.s32.totalorder %v444_v56, 0 }
 0x1f8   :  { %v359_v63 = vrot.slane %v358_v61, 1  ;;  %v370_v0 = vadd.f32 %v369_v62, %v368_v60 }
 0x1fa   :  { %v360_v1 = vadd.f32 %v359_v63, %v358_v61  ;;  %v371_v2 = vrot.slane %v370_v0, 1 }
 0x1fc   :  { %v361_v3 = vmul.f32 0.0625, %v360_v1  ;;  %v372_v4 = vadd.f32 %v371_v2, %v370_v0 }
 0x1fe   :  { %v373_v5 = vmul.f32 0.0625, %v372_v4  ;;  %v374_v6 = vmul.f32 %v361_v3, %v361_v3  ;;  %v376_v7 = vsub.f32 %v343_v47, %v361_v3  ;;  %v377_v8 = vsub.f32 %v348_v45, %v361_v3 }
 0x1ff   :  { %v624_v45 = vrot.slane %v1405_v24, 7 }
 0x200   :  { %v375_v9 = vsub.f32 %v373_v5, %v374_v6 }
 0x202   :  { %v378_v10 = vadd.f32 1e-05, %v375_v9 }
 0x204   :  { %1199 = vrsqrt.f32 %v378_v10 }
 0x20e   :  { %v1200_v20 = vpop.eup %1199 }
 0x20f   :  { %v380_v25 = vmul.f32 %v1200_v20, %v376_v7  ;;  %v381_v26 = vmul.f32 %v1200_v20, %v377_v8 }
 0x211   :  { %v386_v29 = vmul.f32 %v1014_v21, %v380_v25  ;;  %v387_v31 = vmul.f32 %v1014_v21, %v381_v26 }
 0x213   :  { %v392_v37 = vadd.f32 %v1015_v27, %v386_v29  ;;  %v393_v38 = vadd.f32 %v1015_v27, %v387_v31 }
 0x215   :  { %v394_v46 = vmax.f32 %v392_v37, 0.0  ;;  %v395_v47 = vmax.f32 %v393_v38, 0.0 }
 0x217   :  { %v398_v52 = vcombine.high %v394_v46, %v394_v46  ;;  %v405_v53 = vrot.slane %v394_v46, %v404_v16  ;;  %v415_v54 = vcombine.high %v395_v47, %v395_v47  ;;  %v422_v55 = vrot.slane %v395_v47, %v404_v16 }
 0x219   :  { %v412_v57 = vrot.slane %v398_v52, %v404_v16  ;;  %v413_v58 = vcombine.high %v405_v53, %v405_v53  ;;  %v429_v59 = vrot.slane %v415_v54, %v404_v16  ;;  %v430_v60 = vcombine.high %v422_v55, %v422_v55  ;;  %v1016_v54 = vld [vmem:[%s1584_s5 + $0xf] ss:$0 sm:$0xff] }
 0x21a   :  { %v456_v61 = vrot.slane %v405_v53, %v1421_v36  ;;  %v543_v62 = vmul.f32 %v521_v19, %v405_v53  ;;  %v472_v2 = vrot.slane %v422_v55, %v1421_v36  ;;  %v547_v6 = vmul.f32 %v1401_v22, %v422_v55 }
 0x21b   :  { %v414_v63 = vcombine.high %v412_v57, %v412_v57  ;;  %v460_v0 = vrot.slane %v413_v58, %v1421_v36  ;;  %v464_v1 = vrot.slane %v412_v57, %v1421_v36  ;;  %v431_v3 = vcombine.high %v429_v59, %v429_v59 }
 0x21c   :  { %v544_v4 = vmul.f32 %v531_v39, %v413_v58  ;;  %v545_v5 = vmul.f32 %v529_v28, %v412_v57  ;;  %v476_v8 = vrot.slane %v430_v60, %v1421_v36  ;;  %v480_v12 = vrot.slane %v429_v59, %v1421_v36 }
 0x21d   :  { %v468_v7 = vrot.slane %v414_v63, %v1421_v36  ;;  %v486_v9 = vsel %vm485_vm13, %v460_v0, %v456_v61  ;;  %v546_v10 = vmul.f32 %v532_v40, %v414_v63  ;;  %v562_v14 = vrot.slane %v543_v62, %v1424_v41 }
 0x21e   :  { %v488_v13 = vsel %vm487_vm14, %v464_v1, %v486_v9  ;;  %v566_v15 = vrot.slane %v544_v4, %v1424_v41  ;;  %v549_v16 = vmul.f32 %v1412_v32, %v429_v59  ;;  %v570_v17 = vrot.slane %v545_v5, %v1424_v41 }
 0x21f   :  { %v634_v18 = vmul.f32 %v622_v42, %v405_v53  ;;  %v635_v19 = vmul.f32 %v1403_v23, %v413_v58  ;;  %v574_v20 = vrot.slane %v546_v10, %v1424_v41  ;;  %v578_v21 = vrot.slane %v547_v6, %v1424_v41  ;;  %v1019_v6 = vld [vmem:[%s1584_s5 + $0x7] ss:$0 sm:$0xff]  ;;  %v896_v10 = vld [vmem:[%s1583_s4 + $0x8] sm:$0xff] }
 0x220   :  { %v591_v22 = vsel %vm485_vm13, %v566_v15, %v562_v14  ;;  %v636_v25 = vmul.f32 %v623_v48, %v412_v57  ;;  %v637_v26 = vmul.f32 %v620_v34, %v414_v63  ;;  %v490_v29 = vsel %vm489_vm15, %v468_v7, %v488_v13  ;;  %v898_v13 = vld [vmem:[%s1583_s4 + $0x18] sm:$0xff]  ;;  %v899_v15 = vld [vmem:[%s1583_s4 + $0x20] sm:$0xff] }
 0x221   :  { %v653_v27 = vrot.slane %v634_v18, %v1421_v36  ;;  %v657_v28 = vrot.slane %v635_v19, %v1421_v36  ;;  %v638_v31 = vmul.f32 %v624_v45, %v422_v55  ;;  %v484_v32 = vrot.slane %v431_v3, %v1421_v36  ;;  %v901_v18 = vld [vmem:[%s1583_s4 + $0x30] sm:$0xff]  ;;  %v902_v19 = vld [vmem:[%s1583_s4 + $0x38] sm:$0xff] }
 0x222   :  { %v492_v37 = vsel %vm491_vm0, %v472_v2, %v490_v29  ;;  %v548_v23 = vmul.f32 %v533_v49, %v430_v60  ;;  %v661_v38 = vrot.slane %v636_v25, %v1421_v36  ;;  %v550_v42 = vmul.f32 %v534_v50, %v431_v3  ;;  %v907_v29 = vld [vmem:[%s1583_s4 + $0x60] sm:$0xff] }
 0x223   :  { %v682_v39 = vsel %vm485_vm13, %v657_v28, %v653_v27  ;;  %v494_v40 = vsel %vm493_vm1, %v476_v8, %v492_v37  ;;  %v586_v46 = vrot.slane %v549_v16, %v1424_v41  ;;  %v592_v47 = vsel %vm487_vm14, %v570_v17, %v591_v22  ;;  %v900_v16 = vld [vmem:[%s1583_s4 + $0x28] sm:$0xff]  ;;  %v906_v27 = vld [vmem:[%s1583_s4 + $0x58] sm:$0xff]  ;;  %v909_v37 = vld [vmem:[%s1583_s4 + $0x70] sm:$0xff] }
 0x224   :  { %v496_v34 = vsel %vm495_vm2, %v480_v12, %v494_v40  ;;  %v639_v45 = vmul.f32 %v1405_v24, %v430_v60  ;;  %v582_v52 = vrot.slane %v548_v23, %v1424_v41  ;;  %v593_v49 = vsel %vm489_vm15, %v574_v20, %v592_v47  ;;  %v904_v22 = vld [vmem:[%s1583_s4 + $0x48] sm:$0xff]  ;;  %v910_v23 = vld [vmem:[%s1583_s4 + $0x78] sm:$0xff] }
 0x225   :  { %v498_v48 = vsel %vm497_vm3, %v484_v32, %v496_v34  ;;  %v640_v53 = vmul.f32 %v625_v51, %v429_v59  ;;  %v594_v55 = vsel %vm491_vm0, %v578_v21, %v593_v49  ;;  %v641_v56 = vmul.f32 %v1418_v35, %v431_v3  ;;  %v903_v21 = vld [vmem:[%s1583_s4 + $0x40] sm:$0xff] }
 0x226   :  { %v500_v50 = vrot.slane %v498_v48, 7  ;;  %v665_v57 = vrot.slane %v637_v26, %v1421_v36  ;;  %v669_v24 = vrot.slane %v638_v31, %v1421_v36  ;;  %v590_v58 = vrot.slane %v550_v42, %v1424_v41  ;;  %v905_v26 = vld [vmem:[%s1583_s4 + $0x50] sm:$0xff]  ;;  %v908_v31 = vld [vmem:[%s1583_s4 + $0x68] sm:$0xff] }
 0x227   :  { %v595_v60 = vsel %vm493_vm1, %v582_v52, %v594_v55  ;;  %v683_v61 = vsel %vm487_vm14, %v661_v38, %v682_v39  ;;  %v673_v62 = vrot.slane %v639_v45, %v1421_v36  ;;  %v677_v1 = vrot.slane %v640_v53, %v1421_v36  ;;  %v1020_v39 = vld [vmem:[%s1584_s5 + $0x8] ss:$0 sm:$0xff] }
 0x228   :  { %v503_v51 = vsel %vm1440_vm4, 0.0, %v500_v50  ;;  %v596_v59 = vsel %vm495_vm2, %v586_v46, %v595_v60  ;;  %v684_v63 = vsel %vm489_vm15, %v665_v57, %v683_v61  ;;  %v681_v2 = vrot.slane %v641_v56, %v1421_v36  ;;  %v895_v36 = vld [vmem:[%s1583_s4] sm:$0xff] }
 0x229   :  { %v508_v35 = vmul.f32 %v1016_v54, %v503_v51  ;;  %v597_v0 = vsel %vm497_vm3, %v590_v58, %v596_v59  ;;  %v685_v41 = vsel %vm491_vm0, %v669_v24, %v684_v63  ;;  %v1168_v12 = vpack.c.bf16 %v896_v10, %v895_v36 }
 0x22a   :  { %v686_v3 = vsel %vm493_vm1, %v673_v62, %v685_v41  ;;  %v1171_v14 = vpack.c.bf16 %v898_v13, %v897_v11  ;;  %v1174_v17 = vpack.c.bf16 %v900_v16, %v899_v15  ;;  %v1177_v20 = vpack.c.bf16 %v902_v19, %v901_v18 }
 0x22b   :  { %v599_v4 = vadd.f32 %v597_v0, %v508_v35  ;;  %v687_v5 = vsel %vm495_vm2, %v677_v1, %v686_v3  ;;  %1169 = vmatpush3.bf16.msra.mxu1 %v1168_v12  ;;  %v1180_v25 = vpack.c.bf16 %v904_v22, %v903_v21  ;;  %v1183_v28 = vpack.c.bf16 %v906_v27, %v905_v26  ;;  %v1022_v1 = vld [vmem:[%s1584_s5 + $0x9] ss:$0 sm:$0xff] }
 0x22c   :  { %v688_v7 = vsel %vm497_vm3, %v681_v2, %v687_v5  ;;  %1170 = vmatprep.subr.bf16.mxu1 %v1228_v30  ;;  %v1186_v32 = vpack.c.bf16 %v908_v31, %v907_v29  ;;  %v1189_v38 = vpack.c.bf16 %v910_v23, %v909_v37  ;;  %v815_v59 = vmul.u32 4, %v1300_v44  ;;  %v1023_v2 = vld [vmem:[%s1584_s5 + $0xa] ss:$0 sm:$0xff] }
 0x22d   :  { %v690_v8 = vadd.f32 %v688_v7, %v599_v4  ;;  %v814_v62 = vand.u32 127, %v181_v43  ;;  %v1025_v7 = vld [vmem:[%s1584_s5 + $0xb] ss:$0 sm:$0xff] }
 0x22e   :  { %v817_v63 = vadd.s32 4, %v815_v59 }
 0x22f   :  { %v695_v9 = vadd.f32 %v1019_v6, %v690_v8  ;;  %1172 = vmatpush3.bf16.msra.mxu1 %v1171_v14  ;;  %vm816_vm5 = vcmp.ge.s32.totalorder %v814_v62, %v815_v59 }
 0x230   :  { %1173 = vmatprep.subr.bf16.mxu1 %v1228_v30  ;;  %vm818_vm6 = vcmp.lt.s32.totalorder %v814_v62, %v817_v63 }
 0x231   :  { %1099 = vmatmul.mubr.msk.f32.vlgmr.msra.gmra.mrb[4].mxu0 %vm351_vm12, %v695_v9  ;;  %vm819_vm7 = vmand %vm816_vm5, %vm818_vm6 }
 0x232   :  { %1103 = vmatprep.mubr.msk.f32.mxu0 %vm1229_vm11, %v1230_v33  ;;  %v820_v43 = vsel %vm819_vm7, 0.25, %v1230_v33 }
 0x233   :  { %1175 = vmatpush3.bf16.msra.mxu1 %v1174_v17 }
 0x234   :  { %1176 = vmatprep.subr.bf16.mxu1 %v1228_v30 }
 0x237   :  { %1178 = vmatpush3.bf16.msra.mxu1 %v1177_v20 }
 0x238   :  { %1179 = vmatprep.subr.bf16.mxu1 %v1228_v30 }
 0x23b   :  { %1181 = vmatpush3.bf16.msra.mxu1 %v1180_v25 }
 0x23c   :  { %1182 = vmatprep.subr.bf16.mxu1 %v1228_v30 }
 0x23f   :  { %1184 = vmatpush3.bf16.msra.mxu1 %v1183_v28 }
 0x240   :  { %1185 = vmatprep.subr.bf16.mxu1 %v1228_v30 }
 0x243   :  { %1187 = vmatpush3.bf16.msra.mxu1 %v1186_v32 }
 0x244   :  { %1188 = vmatprep.subr.bf16.mxu1 %v1228_v30 }
 0x247   :  { %1190 = vmatpush3.bf16.msra.mxu1 %v1189_v38 }
 0x304   :  { %v777_v40 = vpop.f32.mrb[4].mxu0 }
 0x305   :  { %v778_v42 = vadd.f32 %v1020_v39, %v777_v40  ;;  %v1100_v34 = vpop.f32.mrb[5].mxu0 }
 0x307   :  { %v781_v46 = vrot.slane %v778_v42, 4  ;;  %v788_v47 = vmul.f32 %v778_v42, %v778_v42 }
 0x309   :  { %v782_v45 = vadd.f32 %v781_v46, %v778_v42  ;;  %v789_v48 = vrot.slane %v788_v47, 4 }
 0x30b   :  { %v783_v52 = vrot.slane %v782_v45, 2  ;;  %v790_v49 = vadd.f32 %v789_v48, %v788_v47 }
 0x30d   :  { %v784_v53 = vadd.f32 %v783_v52, %v782_v45  ;;  %v791_v54 = vrot.slane %v790_v49, 2 }
 0x30f   :  { %v785_v50 = vrot.slane %v784_v53, 1  ;;  %v792_v55 = vadd.f32 %v791_v54, %v790_v49 }
 0x311   :  { %v786_v56 = vadd.f32 %v785_v50, %v784_v53  ;;  %v793_v30 = vrot.slane %v792_v55, 1 }
 0x313   :  { %v787_v57 = vmul.f32 0.125, %v786_v56  ;;  %v794_v24 = vadd.f32 %v793_v30, %v792_v55 }
 0x315   :  { %v795_v58 = vmul.f32 0.125, %v794_v24  ;;  %v796_v60 = vmul.f32 %v787_v57, %v787_v57  ;;  %v798_v35 = vsub.f32 %v778_v42, %v787_v57 }
 0x317   :  { %v797_v61 = vsub.f32 %v795_v58, %v796_v60 }
 0x319   :  { %v799_v51 = vadd.f32 1e-05, %v797_v61 }
 0x31b   :  { %1201 = vrsqrt.f32 %v799_v51 }
 0x325   :  { %v1202_v0 = vpop.eup %1201 }
 0x326   :  { %v801_v41 = vmul.f32 %v1202_v0, %v798_v35 }
 0x328   :  { %v806_v3 = vmul.f32 %v1022_v1, %v801_v41 }
 0x32a   :  { %v811_v4 = vadd.f32 %v1023_v2, %v806_v3 }
 0x32c   :  { %v812_v44 = vmax.f32 %v811_v4, 0.0 }
 0x32e   :  { %1102 = vmatpush3.msra.mxu0 %v812_v44 }
 0x32f   :  { %1104 = vmatmul.mubr.msk.f32.vlgmr.msra.gmra.mrb[6].mxu0 %vm821_vm8, %v820_v43 }
 0x402   :  { %v891_v5 = vpop.f32.mrb[6].mxu0 }
 0x403   :  { %v1105_v6 = vpop.f32.mrb[7].mxu0  ;;  %1139 = vmatmul.mubr.f32.vlgmr.msra.gmra.mrb[0].mxu1 %v891_v5 }
 0x4d6   :  { %v981_v8 = vpop.f32.mrb[0].mxu1 }
 0x4d7   :  { %v982_v9 = vadd.f32 %v1025_v7, %v981_v8  ;;  %v1140_v36 = vpop.f32.mrb[1].mxu1 }
 0x4d9   :  { %986 = vst.msk [vmem:[#allocation2] sm:$0x3] %vm985_vm9, %v982_v9 }
 0x4da   :  { %1214 = shalt.err (!%p1211_p4)
}
 0x4db   :  { %s1215_s3 = scalar_lea.hbm %s1585_s6, 32 }
 0x4dc   :  { %p1216_p5 = scmp.ne.s32.totalorder %s1585_s6, %s1215_s3  ;;  %p1219_p6 = scmp.lt.u32.totalorder %s1215_s3, %s1585_s6 }
 0x4de   :  { %p1221_p7 = pnand %p1219_p6, %p1216_p5 }
 0x4e0   :  { %1224 = shalt.err (!%p1221_p7)
}
 0x4e1   :  { %996 = dma.vmem_to_hbm [thread:$0]  %s994_s12, 32, %s1585_s6, [#allocation3]  }
 0x4e2   :  { %1225 = dma.done.wait [#allocation3], 32  }
 0x4e3   :  { %1226 = vsyncadd [#allocation3], 4294967264 }
 0x4e4   :  { %1000 = vsyncpa [#allocation3], 1 }

</bundles_post_ra>
